<compile_context>
chip_gen: v7x
topology: tpu7x:2x2x1
jax: 0.10.0
libtpu: 0.0.40
codegen_flags: <defaults>
</compile_context>

<pallas_src>
import functools

import jax
import jax.numpy as jnp
from jax import lax
from jax.experimental import pallas as pl
from jax.experimental.pallas import tpu as pltpu


def _mtl_kernel(x_ref, h0_ref, c0_ref, wih_ref, whh_ref, b_ref,
                w1_ref, b1_ref, w2_ref, b2_ref,
                heads_ref, *, T, B, H):
    # x_ref: (T*B, D) time-major flattened.
    whh = whh_ref[...]                                           # (H, 4H)

    # Hoist input projection + bias out of the recurrence: one (T*B, D)x(D, 4H)
    # matmul instead of T tiny ones on the serial critical path.
    xproj = (jnp.dot(x_ref[...], wih_ref[...],
                     preferred_element_type=jnp.float32)
             + b_ref[...])                                       # (T*B, 4H)

    h = h0_ref[...]                                              # (B, H)
    c = c0_ref[...]                                              # (B, H)

    # Fully unrolled recurrence (T is small & static). Per step only the
    # h @ W_hh matmul + gate nonlinearities remain on the critical path.
    # The hidden-state history stays in vregs (no per-step VMEM stores).
    hs = []
    for t in range(T):
        gates = xproj[t * B:(t + 1) * B, :] + jnp.dot(
            h, whh, preferred_element_type=jnp.float32)          # (B, 4H)
        # Full 128-lane transcendentals on the EUP slot, then slice the gates
        # out of the already-activated vregs.
        sig = jax.nn.sigmoid(gates)
        tnh = jnp.tanh(gates)
        i = sig[:, 0:H]
        f = sig[:, H:2 * H]
        g = tnh[:, 2 * H:3 * H]
        o = sig[:, 3 * H:4 * H]
        c = f * c + i * g
        h = o * jnp.tanh(c)
        hs.append(h)

    # One concatenate (register/VMEM shuffle, off the serial chain) replaces the
    # previous 8 masked scratch stores + reload.
    X = jnp.concatenate(hs, axis=0)                              # (T*B, H)

    # Fused MLP heads: Linear(H, M) -> ReLU -> Linear(M, 1) for all 6 heads
    # (ctc, p, gk, rs, yz, main) via one (H, 6M) matmul + block-diag (6M, 6).
    h1 = jnp.maximum(
        jnp.dot(X, w1_ref[...], preferred_element_type=jnp.float32) + b1_ref[...],
        0.0)                                                     # (T*B, 6M)
    heads_ref[...] = (jnp.dot(h1, w2_ref[...],
                              preferred_element_type=jnp.float32)
                      + b2_ref[...])                             # (T*B, 6)


def multi_task_forward(x, params, h0, c0):
    """x: (B, T, D) batch-first (PyTorch convention). Returns sigma (B,T,5), weight (B,T)."""
    B, T, D = x.shape
    H = params['w_hh'].shape[0]
    M = params['w1'].shape[1] // 6
    # Time-major flattened rows: row t*B + b = (time t, batch b).
    x_flat = jnp.transpose(x, (1, 0, 2)).reshape(T * B, D)

    # Advisory cost hint so XLA schedules the surrounding tiny ops sensibly.
    flops = (2 * T * B * D * 4 * H            # input projection
             + T * 2 * B * H * 4 * H          # recurrence matmuls
             + 2 * T * B * H * 6 * M          # head layer 1
             + 2 * T * B * 6 * M * 6)         # head layer 2
    transcendentals = T * B * (4 * H + 4 * H + H)   # sigmoid(4H)+tanh(4H)+tanh(c)
    bytes_accessed = 4 * (T * B * D + 2 * B * H
                          + D * 4 * H + H * 4 * H + 4 * H
                          + H * 6 * M + 6 * M + 6 * M * 6 + 6
                          + T * B * 6)

    kernel = functools.partial(_mtl_kernel, T=T, B=B, H=H)
    heads_flat = pl.pallas_call(
        kernel,
        out_shape=jax.ShapeDtypeStruct((T * B, 6), jnp.float32),
        in_specs=[pl.BlockSpec(memory_space=pltpu.MemorySpace.VMEM)] * 10,
        out_specs=pl.BlockSpec(memory_space=pltpu.MemorySpace.VMEM),
        cost_estimate=pl.CostEstimate(flops=flops,
                                      transcendentals=transcendentals,
                                      bytes_accessed=bytes_accessed),
    )(x_flat, h0, c0,
      params['w_ih'], params['w_hh'], params['b'],
      params['w1'], params['b1'], params['w2'], params['b2'])

    heads = jnp.transpose(heads_flat.reshape(T, B, 6), (1, 0, 2))   # (B, T, 6)
    sigma = heads[:, :, 0:5]                                        # (B, T, 5)
    # MainTaskNN ends in Softmax(dim=1); with a (B, T, 1) tensor that is the T axis.
    weight = jax.nn.softmax(heads[:, :, 5], axis=1)                 # (B, T)
    return sigma, weight


def init_params(key, D, H, M):
    """Deterministic parameter init (PyTorch-style uniform(-1/sqrt(fan), 1/sqrt(fan)))."""
    ks = jax.random.split(key, 8)

    def u(k, shape, fan):
        bound = 1.0 / float(fan) ** 0.5
        return jax.random.uniform(k, shape, jnp.float32, -bound, bound)

    # NOTE: gate column order is PyTorch's (i, f, g, o); weights are pre-transposed
    # (in_features, out_features). Preserve this layout when loading real weights.
    w_ih = u(ks[0], (D, 4 * H), H)                 # transposed W_ih (4H, D)
    w_hh = u(ks[1], (H, 4 * H), H)                 # transposed W_hh (4H, H)
    b = u(ks[2], (1, 4 * H), H) + u(ks[3], (1, 4 * H), H)   # b_ih + b_hh

    # 6 heads in order: ctc, p, gk, rs, yz, main
    w1 = u(ks[4], (H, 6 * M), H)                   # concat of 6 first-layer weights (transposed)
    b1 = u(ks[5], (1, 6 * M), H)
    w2_heads = u(ks[6], (6, M), M)                 # each head's (1, M) second-layer weight
    b2 = u(ks[7], (1, 6), M)
    w2 = jnp.zeros((6 * M, 6), jnp.float32)        # block-diagonal second layer
    for t in range(6):
        w2 = w2.at[t * M:(t + 1) * M, t].set(w2_heads[t])

    return dict(w_ih=w_ih, w_hh=w_hh, b=b, w1=w1, b1=b1, w2=w2, b2=b2)


def reference_forward(x, params, h0, c0):
    """Pure-JAX reference of the PyTorch forward (for correctness check)."""
    B, T, D = x.shape
    H = params['w_hh'].shape[0]

    with jax.default_matmul_precision("highest"):
        def step(carry, xt):
            h, c = carry
            gates = xt @ params['w_ih'] + h @ params['w_hh'] + params['b']
            i = jax.nn.sigmoid(gates[:, :H])
            f = jax.nn.sigmoid(gates[:, H:2 * H])
            g = jnp.tanh(gates[:, 2 * H:3 * H])
            o = jax.nn.sigmoid(gates[:, 3 * H:])
            c = f * c + i * g
            h = o * jnp.tanh(c)
            return (h, c), h

        _, hs = lax.scan(step, (h0, c0), jnp.transpose(x, (1, 0, 2)))
        lstm_out = jnp.transpose(hs, (1, 0, 2))                       # (B, T, H)
        h1 = jnp.maximum(lstm_out.reshape(B * T, H) @ params['w1'] + params['b1'], 0.0)
        heads = (h1 @ params['w2'] + params['b2']).reshape(B, T, 6)
    sigma = heads[:, :, :5]                                           # (B, T, 5)
    weight = jax.nn.softmax(heads[:, :, 5], axis=1)                   # (B, T)
    return sigma, weight


if __name__ == "__main__":
    # Small shapes implied by the module: batch=2, seq=8, input_size=4,
    # lstm_hidden_size=32, mlp_hidden_size=32, output=1, 1 LSTM layer, 1 MLP layer.
    B, T, D, H, M = 2, 8, 4, 32, 32
    key = jax.random.PRNGKey(0)
    kx, kh, kc, kp = jax.random.split(key, 4)

    x = jax.random.normal(kx, (B, T, D), jnp.float32)
    h0 = jax.random.normal(kh, (B, H), jnp.float32)
    c0 = jax.random.normal(kc, (B, H), jnp.float32)
    params = init_params(kp, D, H, M)

    sigma, weight = multi_task_forward(x, params, h0, c0)
    jax.block_until_ready((sigma, weight))

    ref_sigma, ref_weight = reference_forward(x, params, h0, c0)
    assert sigma.shape == (B, T, 5) and weight.shape == (B, T)
    assert jnp.allclose(sigma, ref_sigma, atol=1e-4, rtol=1e-4)
    assert jnp.allclose(weight, ref_weight, atol=1e-4, rtol=1e-4)

    print("KERNEL_OK")
</pallas_src>

<mosaic_0001>
module attributes {stable_mosaic.version = 11 : i64} {
  func.func @_mtl_kernel(%arg0: memref<16x4xf32, #tpu.memory_space<vmem>>, %arg1: memref<2x32xf32, #tpu.memory_space<vmem>>, %arg2: memref<2x32xf32, #tpu.memory_space<vmem>>, %arg3: memref<4x128xf32, #tpu.memory_space<vmem>>, %arg4: memref<32x128xf32, #tpu.memory_space<vmem>>, %arg5: memref<1x128xf32, #tpu.memory_space<vmem>>, %arg6: memref<32x192xf32, #tpu.memory_space<vmem>>, %arg7: memref<1x192xf32, #tpu.memory_space<vmem>>, %arg8: memref<192x6xf32, #tpu.memory_space<vmem>>, %arg9: memref<1x6xf32, #tpu.memory_space<vmem>>, %arg10: memref<16x6xf32, #tpu.memory_space<vmem>>) attributes {dimension_semantics = [], scalar_prefetch = 0 : i64, scratch_operands = 0 : i64, tpu.core_type = #tpu.core_type<tc>} {
    %c0 = arith.constant 0 : index
    %c0_0 = arith.constant 0 : index
    %0 = vector.load %arg4[%c0, %c0_0] : memref<32x128xf32, #tpu.memory_space<vmem>>, vector<32x128xf32>
    %c0_1 = arith.constant 0 : index
    %c0_2 = arith.constant 0 : index
    %1 = vector.load %arg0[%c0_1, %c0_2] : memref<16x4xf32, #tpu.memory_space<vmem>>, vector<16x4xf32>
    %c0_3 = arith.constant 0 : index
    %c0_4 = arith.constant 0 : index
    %2 = vector.load %arg3[%c0_3, %c0_4] : memref<4x128xf32, #tpu.memory_space<vmem>>, vector<4x128xf32>
    %cst = arith.constant dense<0.000000e+00> : vector<16x128xf32>
    %3 = tpu.matmul %1, %2, %cst {dimension_numbers = #tpu.dot_dimension_numbers<[1], [0], [0], [1], [0, 0, 1, 1], [], []>} : vector<16x4xf32>, vector<4x128xf32>, vector<16x128xf32> -> vector<16x128xf32>
    %c0_5 = arith.constant 0 : index
    %c0_6 = arith.constant 0 : index
    %4 = vector.load %arg5[%c0_5, %c0_6] : memref<1x128xf32, #tpu.memory_space<vmem>>, vector<1x128xf32>
    %5 = vector.broadcast %4 : vector<1x128xf32> to vector<16x128xf32>
    %6 = arith.addf %3, %5 : vector<16x128xf32>
    %c0_7 = arith.constant 0 : index
    %c0_8 = arith.constant 0 : index
    %7 = vector.load %arg1[%c0_7, %c0_8] : memref<2x32xf32, #tpu.memory_space<vmem>>, vector<2x32xf32>
    %c0_9 = arith.constant 0 : index
    %c0_10 = arith.constant 0 : index
    %8 = vector.load %arg2[%c0_9, %c0_10] : memref<2x32xf32, #tpu.memory_space<vmem>>, vector<2x32xf32>
    %9 = vector.extract_strided_slice %6 {offsets = [0, 0], sizes = [2, 128], strides = [1, 1]} : vector<16x128xf32> to vector<2x128xf32>
    %cst_11 = arith.constant dense<0.000000e+00> : vector<2x128xf32>
    %10 = tpu.matmul %7, %0, %cst_11 {dimension_numbers = #tpu.dot_dimension_numbers<[1], [0], [0], [1], [0, 0, 1, 1], [], []>} : vector<2x32xf32>, vector<32x128xf32>, vector<2x128xf32> -> vector<2x128xf32>
    %11 = arith.addf %9, %10 : vector<2x128xf32>
    %12 = arith.negf %11 : vector<2x128xf32>
    %13 = math.exp %12 : vector<2x128xf32>
    %cst_12 = arith.constant 1.000000e+00 : f32
    %14 = vector.broadcast %cst_12 : f32 to vector<2x128xf32>
    %15 = arith.addf %14, %13 : vector<2x128xf32>
    %16 = arith.divf %14, %15 : vector<2x128xf32>
    %17 = math.tanh %11 : vector<2x128xf32>
    %18 = vector.extract_strided_slice %16 {offsets = [0, 0], sizes = [2, 32], strides = [1, 1]} : vector<2x128xf32> to vector<2x32xf32>
    %19 = vector.extract_strided_slice %16 {offsets = [0, 32], sizes = [2, 32], strides = [1, 1]} : vector<2x128xf32> to vector<2x32xf32>
    %20 = vector.extract_strided_slice %17 {offsets = [0, 64], sizes = [2, 32], strides = [1, 1]} : vector<2x128xf32> to vector<2x32xf32>
    %21 = vector.extract_strided_slice %16 {offsets = [0, 96], sizes = [2, 32], strides = [1, 1]} : vector<2x128xf32> to vector<2x32xf32>
    %22 = arith.mulf %19, %8 : vector<2x32xf32>
    %23 = arith.mulf %18, %20 : vector<2x32xf32>
    %24 = arith.addf %22, %23 : vector<2x32xf32>
    %25 = math.tanh %24 : vector<2x32xf32>
    %26 = arith.mulf %21, %25 : vector<2x32xf32>
    %27 = vector.extract_strided_slice %6 {offsets = [2, 0], sizes = [2, 128], strides = [1, 1]} : vector<16x128xf32> to vector<2x128xf32>
    %cst_13 = arith.constant dense<0.000000e+00> : vector<2x128xf32>
    %28 = tpu.matmul %26, %0, %cst_13 {dimension_numbers = #tpu.dot_dimension_numbers<[1], [0], [0], [1], [0, 0, 1, 1], [], []>} : vector<2x32xf32>, vector<32x128xf32>, vector<2x128xf32> -> vector<2x128xf32>
    %29 = arith.addf %27, %28 : vector<2x128xf32>
    %30 = arith.negf %29 : vector<2x128xf32>
    %31 = math.exp %30 : vector<2x128xf32>
    %cst_14 = arith.constant 1.000000e+00 : f32
    %32 = vector.broadcast %cst_14 : f32 to vector<2x128xf32>
    %33 = arith.addf %32, %31 : vector<2x128xf32>
    %34 = arith.divf %32, %33 : vector<2x128xf32>
    %35 = math.tanh %29 : vector<2x128xf32>
    %36 = vector.extract_strided_slice %34 {offsets = [0, 0], sizes = [2, 32], strides = [1, 1]} : vector<2x128xf32> to vector<2x32xf32>
    %37 = vector.extract_strided_slice %34 {offsets = [0, 32], sizes = [2, 32], strides = [1, 1]} : vector<2x128xf32> to vector<2x32xf32>
    %38 = vector.extract_strided_slice %35 {offsets = [0, 64], sizes = [2, 32], strides = [1, 1]} : vector<2x128xf32> to vector<2x32xf32>
    %39 = vector.extract_strided_slice %34 {offsets = [0, 96], sizes = [2, 32], strides = [1, 1]} : vector<2x128xf32> to vector<2x32xf32>
    %40 = arith.mulf %37, %24 : vector<2x32xf32>
    %41 = arith.mulf %36, %38 : vector<2x32xf32>
    %42 = arith.addf %40, %41 : vector<2x32xf32>
    %43 = math.tanh %42 : vector<2x32xf32>
    %44 = arith.mulf %39, %43 : vector<2x32xf32>
    %45 = vector.extract_strided_slice %6 {offsets = [4, 0], sizes = [2, 128], strides = [1, 1]} : vector<16x128xf32> to vector<2x128xf32>
    %cst_15 = arith.constant dense<0.000000e+00> : vector<2x128xf32>
    %46 = tpu.matmul %44, %0, %cst_15 {dimension_numbers = #tpu.dot_dimension_numbers<[1], [0], [0], [1], [0, 0, 1, 1], [], []>} : vector<2x32xf32>, vector<32x128xf32>, vector<2x128xf32> -> vector<2x128xf32>
    %47 = arith.addf %45, %46 : vector<2x128xf32>
    %48 = arith.negf %47 : vector<2x128xf32>
    %49 = math.exp %48 : vector<2x128xf32>
    %cst_16 = arith.constant 1.000000e+00 : f32
    %50 = vector.broadcast %cst_16 : f32 to vector<2x128xf32>
    %51 = arith.addf %50, %49 : vector<2x128xf32>
    %52 = arith.divf %50, %51 : vector<2x128xf32>
    %53 = math.tanh %47 : vector<2x128xf32>
    %54 = vector.extract_strided_slice %52 {offsets = [0, 0], sizes = [2, 32], strides = [1, 1]} : vector<2x128xf32> to vector<2x32xf32>
    %55 = vector.extract_strided_slice %52 {offsets = [0, 32], sizes = [2, 32], strides = [1, 1]} : vector<2x128xf32> to vector<2x32xf32>
    %56 = vector.extract_strided_slice %53 {offsets = [0, 64], sizes = [2, 32], strides = [1, 1]} : vector<2x128xf32> to vector<2x32xf32>
    %57 = vector.extract_strided_slice %52 {offsets = [0, 96], sizes = [2, 32], strides = [1, 1]} : vector<2x128xf32> to vector<2x32xf32>
    %58 = arith.mulf %55, %42 : vector<2x32xf32>
    %59 = arith.mulf %54, %56 : vector<2x32xf32>
    %60 = arith.addf %58, %59 : vector<2x32xf32>
    %61 = math.tanh %60 : vector<2x32xf32>
    %62 = arith.mulf %57, %61 : vector<2x32xf32>
    %63 = vector.extract_strided_slice %6 {offsets = [6, 0], sizes = [2, 128], strides = [1, 1]} : vector<16x128xf32> to vector<2x128xf32>
    %cst_17 = arith.constant dense<0.000000e+00> : vector<2x128xf32>
    %64 = tpu.matmul %62, %0, %cst_17 {dimension_numbers = #tpu.dot_dimension_numbers<[1], [0], [0], [1], [0, 0, 1, 1], [], []>} : vector<2x32xf32>, vector<32x128xf32>, vector<2x128xf32> -> vector<2x128xf32>
    %65 = arith.addf %63, %64 : vector<2x128xf32>
    %66 = arith.negf %65 : vector<2x128xf32>
    %67 = math.exp %66 : vector<2x128xf32>
    %cst_18 = arith.constant 1.000000e+00 : f32
    %68 = vector.broadcast %cst_18 : f32 to vector<2x128xf32>
    %69 = arith.addf %68, %67 : vector<2x128xf32>
    %70 = arith.divf %68, %69 : vector<2x128xf32>
    %71 = math.tanh %65 : vector<2x128xf32>
    %72 = vector.extract_strided_slice %70 {offsets = [0, 0], sizes = [2, 32], strides = [1, 1]} : vector<2x128xf32> to vector<2x32xf32>
    %73 = vector.extract_strided_slice %70 {offsets = [0, 32], sizes = [2, 32], strides = [1, 1]} : vector<2x128xf32> to vector<2x32xf32>
    %74 = vector.extract_strided_slice %71 {offsets = [0, 64], sizes = [2, 32], strides = [1, 1]} : vector<2x128xf32> to vector<2x32xf32>
    %75 = vector.extract_strided_slice %70 {offsets = [0, 96], sizes = [2, 32], strides = [1, 1]} : vector<2x128xf32> to vector<2x32xf32>
    %76 = arith.mulf %73, %60 : vector<2x32xf32>
    %77 = arith.mulf %72, %74 : vector<2x32xf32>
    %78 = arith.addf %76, %77 : vector<2x32xf32>
    %79 = math.tanh %78 : vector<2x32xf32>
    %80 = arith.mulf %75, %79 : vector<2x32xf32>
    %81 = vector.extract_strided_slice %6 {offsets = [8, 0], sizes = [2, 128], strides = [1, 1]} : vector<16x128xf32> to vector<2x128xf32>
    %cst_19 = arith.constant dense<0.000000e+00> : vector<2x128xf32>
    %82 = tpu.matmul %80, %0, %cst_19 {dimension_numbers = #tpu.dot_dimension_numbers<[1], [0], [0], [1], [0, 0, 1, 1], [], []>} : vector<2x32xf32>, vector<32x128xf32>, vector<2x128xf32> -> vector<2x128xf32>
    %83 = arith.addf %81, %82 : vector<2x128xf32>
    %84 = arith.negf %83 : vector<2x128xf32>
    %85 = math.exp %84 : vector<2x128xf32>
    %cst_20 = arith.constant 1.000000e+00 : f32
    %86 = vector.broadcast %cst_20 : f32 to vector<2x128xf32>
    %87 = arith.addf %86, %85 : vector<2x128xf32>
    %88 = arith.divf %86, %87 : vector<2x128xf32>
    %89 = math.tanh %83 : vector<2x128xf32>
    %90 = vector.extract_strided_slice %88 {offsets = [0, 0], sizes = [2, 32], strides = [1, 1]} : vector<2x128xf32> to vector<2x32xf32>
    %91 = vector.extract_strided_slice %88 {offsets = [0, 32], sizes = [2, 32], strides = [1, 1]} : vector<2x128xf32> to vector<2x32xf32>
    %92 = vector.extract_strided_slice %89 {offsets = [0, 64], sizes = [2, 32], strides = [1, 1]} : vector<2x128xf32> to vector<2x32xf32>
    %93 = vector.extract_strided_slice %88 {offsets = [0, 96], sizes = [2, 32], strides = [1, 1]} : vector<2x128xf32> to vector<2x32xf32>
    %94 = arith.mulf %91, %78 : vector<2x32xf32>
    %95 = arith.mulf %90, %92 : vector<2x32xf32>
    %96 = arith.addf %94, %95 : vector<2x32xf32>
    %97 = math.tanh %96 : vector<2x32xf32>
    %98 = arith.mulf %93, %97 : vector<2x32xf32>
    %99 = vector.extract_strided_slice %6 {offsets = [10, 0], sizes = [2, 128], strides = [1, 1]} : vector<16x128xf32> to vector<2x128xf32>
    %cst_21 = arith.constant dense<0.000000e+00> : vector<2x128xf32>
    %100 = tpu.matmul %98, %0, %cst_21 {dimension_numbers = #tpu.dot_dimension_numbers<[1], [0], [0], [1], [0, 0, 1, 1], [], []>} : vector<2x32xf32>, vector<32x128xf32>, vector<2x128xf32> -> vector<2x128xf32>
    %101 = arith.addf %99, %100 : vector<2x128xf32>
    %102 = arith.negf %101 : vector<2x128xf32>
    %103 = math.exp %102 : vector<2x128xf32>
    %cst_22 = arith.constant 1.000000e+00 : f32
    %104 = vector.broadcast %cst_22 : f32 to vector<2x128xf32>
    %105 = arith.addf %104, %103 : vector<2x128xf32>
    %106 = arith.divf %104, %105 : vector<2x128xf32>
    %107 = math.tanh %101 : vector<2x128xf32>
    %108 = vector.extract_strided_slice %106 {offsets = [0, 0], sizes = [2, 32], strides = [1, 1]} : vector<2x128xf32> to vector<2x32xf32>
    %109 = vector.extract_strided_slice %106 {offsets = [0, 32], sizes = [2, 32], strides = [1, 1]} : vector<2x128xf32> to vector<2x32xf32>
    %110 = vector.extract_strided_slice %107 {offsets = [0, 64], sizes = [2, 32], strides = [1, 1]} : vector<2x128xf32> to vector<2x32xf32>
    %111 = vector.extract_strided_slice %106 {offsets = [0, 96], sizes = [2, 32], strides = [1, 1]} : vector<2x128xf32> to vector<2x32xf32>
    %112 = arith.mulf %109, %96 : vector<2x32xf32>
    %113 = arith.mulf %108, %110 : vector<2x32xf32>
    %114 = arith.addf %112, %113 : vector<2x32xf32>
    %115 = math.tanh %114 : vector<2x32xf32>
    %116 = arith.mulf %111, %115 : vector<2x32xf32>
    %117 = vector.extract_strided_slice %6 {offsets = [12, 0], sizes = [2, 128], strides = [1, 1]} : vector<16x128xf32> to vector<2x128xf32>
    %cst_23 = arith.constant dense<0.000000e+00> : vector<2x128xf32>
    %118 = tpu.matmul %116, %0, %cst_23 {dimension_numbers = #tpu.dot_dimension_numbers<[1], [0], [0], [1], [0, 0, 1, 1], [], []>} : vector<2x32xf32>, vector<32x128xf32>, vector<2x128xf32> -> vector<2x128xf32>
    %119 = arith.addf %117, %118 : vector<2x128xf32>
    %120 = arith.negf %119 : vector<2x128xf32>
    %121 = math.exp %120 : vector<2x128xf32>
    %cst_24 = arith.constant 1.000000e+00 : f32
    %122 = vector.broadcast %cst_24 : f32 to vector<2x128xf32>
    %123 = arith.addf %122, %121 : vector<2x128xf32>
    %124 = arith.divf %122, %123 : vector<2x128xf32>
    %125 = math.tanh %119 : vector<2x128xf32>
    %126 = vector.extract_strided_slice %124 {offsets = [0, 0], sizes = [2, 32], strides = [1, 1]} : vector<2x128xf32> to vector<2x32xf32>
    %127 = vector.extract_strided_slice %124 {offsets = [0, 32], sizes = [2, 32], strides = [1, 1]} : vector<2x128xf32> to vector<2x32xf32>
    %128 = vector.extract_strided_slice %125 {offsets = [0, 64], sizes = [2, 32], strides = [1, 1]} : vector<2x128xf32> to vector<2x32xf32>
    %129 = vector.extract_strided_slice %124 {offsets = [0, 96], sizes = [2, 32], strides = [1, 1]} : vector<2x128xf32> to vector<2x32xf32>
    %130 = arith.mulf %127, %114 : vector<2x32xf32>
    %131 = arith.mulf %126, %128 : vector<2x32xf32>
    %132 = arith.addf %130, %131 : vector<2x32xf32>
    %133 = math.tanh %132 : vector<2x32xf32>
    %134 = arith.mulf %129, %133 : vector<2x32xf32>
    %135 = vector.extract_strided_slice %6 {offsets = [14, 0], sizes = [2, 128], strides = [1, 1]} : vector<16x128xf32> to vector<2x128xf32>
    %cst_25 = arith.constant dense<0.000000e+00> : vector<2x128xf32>
    %136 = tpu.matmul %134, %0, %cst_25 {dimension_numbers = #tpu.dot_dimension_numbers<[1], [0], [0], [1], [0, 0, 1, 1], [], []>} : vector<2x32xf32>, vector<32x128xf32>, vector<2x128xf32> -> vector<2x128xf32>
    %137 = arith.addf %135, %136 : vector<2x128xf32>
    %138 = arith.negf %137 : vector<2x128xf32>
    %139 = math.exp %138 : vector<2x128xf32>
    %cst_26 = arith.constant 1.000000e+00 : f32
    %140 = vector.broadcast %cst_26 : f32 to vector<2x128xf32>
    %141 = arith.addf %140, %139 : vector<2x128xf32>
    %142 = arith.divf %140, %141 : vector<2x128xf32>
    %143 = math.tanh %137 : vector<2x128xf32>
    %144 = vector.extract_strided_slice %142 {offsets = [0, 0], sizes = [2, 32], strides = [1, 1]} : vector<2x128xf32> to vector<2x32xf32>
    %145 = vector.extract_strided_slice %142 {offsets = [0, 32], sizes = [2, 32], strides = [1, 1]} : vector<2x128xf32> to vector<2x32xf32>
    %146 = vector.extract_strided_slice %143 {offsets = [0, 64], sizes = [2, 32], strides = [1, 1]} : vector<2x128xf32> to vector<2x32xf32>
    %147 = vector.extract_strided_slice %142 {offsets = [0, 96], sizes = [2, 32], strides = [1, 1]} : vector<2x128xf32> to vector<2x32xf32>
    %148 = arith.mulf %145, %132 : vector<2x32xf32>
    %149 = arith.mulf %144, %146 : vector<2x32xf32>
    %150 = arith.addf %148, %149 : vector<2x32xf32>
    %151 = math.tanh %150 : vector<2x32xf32>
    %152 = arith.mulf %147, %151 : vector<2x32xf32>
    %153 = tpu.concatenate %26, %44, %62, %80, %98, %116, %134, %152 in 0 : vector<2x32xf32>, vector<2x32xf32>, vector<2x32xf32>, vector<2x32xf32>, vector<2x32xf32>, vector<2x32xf32>, vector<2x32xf32>, vector<2x32xf32> -> vector<16x32xf32>
    %c0_27 = arith.constant 0 : index
    %c0_28 = arith.constant 0 : index
    %154 = vector.load %arg6[%c0_27, %c0_28] : memref<32x192xf32, #tpu.memory_space<vmem>>, vector<32x192xf32>
    %cst_29 = arith.constant dense<0.000000e+00> : vector<16x192xf32>
    %155 = tpu.matmul %153, %154, %cst_29 {dimension_numbers = #tpu.dot_dimension_numbers<[1], [0], [0], [1], [0, 0, 1, 1], [], []>} : vector<16x32xf32>, vector<32x192xf32>, vector<16x192xf32> -> vector<16x192xf32>
    %c0_30 = arith.constant 0 : index
    %c0_31 = arith.constant 0 : index
    %156 = vector.load %arg7[%c0_30, %c0_31] : memref<1x192xf32, #tpu.memory_space<vmem>>, vector<1x192xf32>
    %157 = vector.broadcast %156 : vector<1x192xf32> to vector<16x192xf32>
    %158 = arith.addf %155, %157 : vector<16x192xf32>
    %cst_32 = arith.constant 0.000000e+00 : f32
    %159 = vector.broadcast %cst_32 : f32 to vector<16x192xf32>
    %160 = arith.maximumf %158, %159 : vector<16x192xf32>
    %c0_33 = arith.constant 0 : index
    %c0_34 = arith.constant 0 : index
    %161 = vector.load %arg8[%c0_33, %c0_34] : memref<192x6xf32, #tpu.memory_space<vmem>>, vector<192x6xf32>
    %cst_35 = arith.constant dense<0.000000e+00> : vector<16x6xf32>
    %162 = tpu.matmul %160, %161, %cst_35 {dimension_numbers = #tpu.dot_dimension_numbers<[1], [0], [0], [1], [0, 0, 1, 1], [], []>} : vector<16x192xf32>, vector<192x6xf32>, vector<16x6xf32> -> vector<16x6xf32>
    %c0_36 = arith.constant 0 : index
    %c0_37 = arith.constant 0 : index
    %163 = vector.load %arg9[%c0_36, %c0_37] : memref<1x6xf32, #tpu.memory_space<vmem>>, vector<1x6xf32>
    %164 = vector.broadcast %163 : vector<1x6xf32> to vector<16x6xf32>
    %165 = arith.addf %162, %164 : vector<16x6xf32>
    %c0_38 = arith.constant 0 : index
    %c0_39 = arith.constant 0 : index
    %166 = vector.load %arg10[%c0_38, %c0_39] : memref<16x6xf32, #tpu.memory_space<vmem>>, vector<16x6xf32>
    tpu.vector_store %arg10[%c0_38, %c0_39], %165 {strides = array<i32>} : memref<16x6xf32, #tpu.memory_space<vmem>>, vector<16x6xf32>,
    return
  }
}

</mosaic_0001>

<bundles_post_ra>
// kernel: tpu_custom_call.1
= control target key start
LH: loop header
LB: loop body
LE: loop exit
PB: predicated region body
PF: predicated region fallthrough
CT: control target
= control target key end

     0   :  { %vm56_vm0 = vcmask 1043456   ;;  %vm49_vm1 = vcmask 31744   ;;  %v1545_v3 = vmov 0.0|0.0   ;;  %vm1546_vm2 = vmmov 0   ;;  %s1548_s27 = smov 64   ;;  %s1896_s3 = inlined_call_operand.vmem [shape: f32[4,128], index: 3, kind: input, shape index: {}]   ;;  %s1897_s0 = inlined_call_operand.vmem [shape: f32[16,4], index: 0, kind: input, shape index: {}]   ;;  %s1898_s4 = inlined_call_operand.vmem [shape: f32[32,128], index: 4, kind: input, shape index: {}]   ;;  %s1899_s1 = inlined_call_operand.vmem [shape: f32[2,32], index: 1, kind: input, shape index: {}]   ;;  %s1900_s5 = inlined_call_operand.vmem [shape: f32[1,128], index: 5, kind: input, shape index: {}]   ;;  %s1901_s2 = inlined_call_operand.vmem [shape: f32[2,32], index: 2, kind: input, shape index: {}]   ;;  %s1902_s6 = inlined_call_operand.vmem [shape: f32[32,192], index: 6, kind: input, shape index: {}]   ;;  %s1903_s8 = inlined_call_operand.vmem [shape: f32[192,6], index: 8, kind: input, shape index: {}]   ;;  %s1904_s7 = inlined_call_operand.vmem [shape: f32[1,192], index: 7, kind: input, shape index: {}]   ;;  %s1905_s9 = inlined_call_operand.vmem [shape: f32[1,6], index: 9, kind: input, shape index: {}]   ;;  %s1906_s10 = inlined_call_operand.vmem [shape: f32[16,6], index: 10, kind: output, shape index: {}]  }
   0x1   :  { %v41_v0 = vld [vmem:[%s1896_s3] sm:$0xf]  ;;  %v40_v2 = vld [vmem:[%s1897_s0 + $0x8] sm:$0xff]  ;;  %1414 = vmatprep.subr.bf16.mxu0 %v1545_v3  ;;  %v37_v6 = vld [vmem:[%s1898_s4 + $0x10] sm:$0xff]  ;;  %v1547_v9 = vmov 0.0   ;;  %vm137_vm3 = vcmask 261120  }
   0x2   :  { %v39_v1 = vld [vmem:[%s1897_s0] sm:$0xff]  ;;  %1291 = vmatprep.subr.msk.mxu1 %vm56_vm0, %v41_v0  ;;  %v36_v5 = vld [vmem:[%s1898_s4 + $0x8] sm:$0xff]  ;;  %v38_v8 = vld [vmem:[%s1898_s4 + $0x18] sm:$0xff]  ;;  %1359 = vmatprep.mubr.msk.f32.mxu0 %vm1546_vm2, %v1547_v9  ;;  %vm984_vm4 = vcmask 1041408   ;;  %vm987_vm5 = vcmask 1045504   ;;  %vm1134_vm6 = vcmask 523264  }
   0x3   :  { %1293 = vmatprep.mubr.msk.f32.mxu1 %vm49_vm1, %v39_v1  ;;  %v35_v4 = vld [vmem:[%s1898_s4] sm:$0xff]  ;;  %1292 = vmatpush3.msk.msra.mxu1 %vm56_vm0, %v41_v0  ;;  %v1637_v10 = vpack.c.bf16 %v38_v8, %v37_v6  ;;  %vm1216_vm7 = vcmask 48128  }
   0x4   :  { %v1627_v7 = vpack.c.bf16 %v36_v5, %v35_v4  ;;  %1294 = vmatmul.mubr.msk.f32.vlgmr.msra.gmra.mrb[0].mxu1 %vm49_vm1, %v40_v2  ;;  %1384 = vmatprep.subr.bf16.mxu1 %v1545_v3  ;;  %v135_v11 = vld [vmem:[%s1899_s1] sm:$0x3] }
   0x5   :  { %1304 = vmatprep.mubr.msk.f32.mxu1 %vm1546_vm2, %v1547_v9  ;;  %v1223_v12 = vld [vmem:[%s1900_s5] ss:$0 sm:$0xff]  ;;  %s1549_s5 = smov 32  }
   0x6   :  { %1386 = vmatpush3.bf16.msra.mxu1 %v1627_v7  ;;  %1416 = vmatpush3.bf16.msra.mxu0 %v1627_v7  ;;  %v136_v21 = vld [vmem:[%s1901_s2] sm:$0x3] }
   0x7   :  { %1387 = vmatprep.subr.bf16.mxu1 %v1545_v3  ;;  %1417 = vmatprep.subr.bf16.mxu0 %v1545_v3 }
   0xa   :  { %1389 = vmatpush3.bf16.msra.mxu1 %v1637_v10  ;;  %1419 = vmatpush3.bf16.msra.mxu0 %v1637_v10 }
   0xb   :  { %1390 = vmatprep.subr.bf16.mxu1 %v1545_v3  ;;  %1426 = vmatprep.subr.bf16.mxu0 %v1545_v3 }
   0xd   :  { %1305 = vmatmul.mubr.msk.f32.vlgmr.msra.gmra.mrb[2].mxu1 %vm137_vm3, %v135_v11 }
   0xe   :  { %1392 = vmatpush3.bf16.msra.mxu1 %v1627_v7  ;;  %1315 = vmatprep.mubr.msk.f32.mxu1 %vm1546_vm2, %v1547_v9 }
   0xf   :  { %1393 = vmatprep.subr.bf16.mxu1 %v1545_v3 }
  0x12   :  { %1395 = vmatpush3.bf16.msra.mxu1 %v1637_v10 }
  0x13   :  { %1396 = vmatprep.subr.bf16.mxu1 %v1545_v3 }
  0xd7   :  { %v1295_v13 = vpop.f32.mrb[0].mxu1 }
  0xd8   :  { %v1661_v14 = vadd.f32 %v1295_v13, %v1223_v12  ;;  %v126_v15 = vpop.f32.mrb[1].mxu1 }
  0xd9   :  { %v1663_v16 = vadd.f32 %v1223_v12, %v126_v15 }
  0xe0   :  { %v207_v17 = vpop.f32.mrb[2].mxu1 }
  0xe1   :  { %v211_v18 = vadd.f32 %v207_v17, %v1663_v16  ;;  %v1306_v19 = vpop.f32.mrb[3].mxu1 }
  0xe3   :  { %1481 = vtanh.f32 %v211_v18  ;;  %v1228_v22 = vmul.f32 -1.442695, %v211_v18 }
  0xe5   :  { %1483 = vpow2.f32 %v1228_v22 }
  0xed   :  { %v1482_v20 = vpop.eup %1481 }
  0xee   :  { %225 = vrot.lane.b32.xlu0 %v1482_v20, %s1548_s27 }
  0xef   :  { %v1484_v23 = vpop.eup %1483 }
  0xf0   :  { %v215_v24 = vadd.f32 1.0, %v1484_v23 }
  0xf2   :  { %220 = vrot.lane.b32.xlu0 %v136_v21, %s1549_s5  ;;  %1485 = vrcp.f32 %v215_v24 }
  0xfc   :  { %v1486_v25 = vpop.eup %1485 }
 0x160   :  { %v226_v26 = vpop.permute.xlu0 %225 }
 0x161   :  { %v228_v27 = vmul.f32 %v1486_v25, %v226_v26 }
 0x163   :  { %230 = vrot.lane.b32.xlu1 %v228_v27, %s1549_s5 }
 0x164   :  { %v221_v28 = vpop.permute.xlu0 %220 }
 0x165   :  { %v223_v29 = vmul.f32 %v1486_v25, %v221_v28 }
 0x1d5   :  { %v231_v30 = vpop.permute.xlu1 %230 }
 0x1d6   :  { %v233_v31 = vadd.f32 %v231_v30, %v223_v29 }
 0x1d8   :  { %1487 = vtanh.f32 %v233_v31  ;;  %v327_v47 = vrot.slane %v233_v31, 6 }
 0x1e2   :  { %v1488_v32 = vpop.eup %1487 }
 0x1e3   :  { %236 = vrot.lane.b32.xlu1 %v1488_v32, %s1548_s27 }
 0x255   :  { %v237_v33 = vpop.permute.xlu1 %236 }
 0x256   :  { %v1673_v34 = vmul.f32 %v1486_v25, %v237_v33 }
 0x258   :  { %241 = vrot.lane.b32.xlu0 %v1673_v34, %s1549_s5 }
 0x2ca   :  { %v242_v35 = vpop.permute.xlu0 %241 }
 0x2cb   :  { %1316 = vmatmul.mubr.msk.f32.vlgmr.msra.gmra.mrb[4].mxu1 %vm137_vm3, %v242_v35 }
 0x2cc   :  { %1398 = vmatpush3.bf16.msra.mxu1 %v1627_v7  ;;  %1326 = vmatprep.mubr.msk.f32.mxu1 %vm1546_vm2, %v1547_v9 }
 0x2cd   :  { %1399 = vmatprep.subr.bf16.mxu1 %v1545_v3 }
 0x2d0   :  { %1401 = vmatpush3.bf16.msra.mxu1 %v1637_v10 }
 0x2d1   :  { %1402 = vmatprep.subr.bf16.mxu1 %v1545_v3 }
 0x39e   :  { %v311_v36 = vpop.f32.mrb[4].mxu1 }
 0x39f   :  { %v316_v37 = vrot.slane %v311_v36, 6  ;;  %v1317_v38 = vpop.f32.mrb[5].mxu1 }
 0x3a1   :  { %v318_v39 = vadd.f32 %v316_v37, %v1663_v16 }
 0x3a3   :  { %1489 = vtanh.f32 %v318_v39  ;;  %v1230_v41 = vmul.f32 -1.442695, %v318_v39 }
 0x3a5   :  { %1491 = vpow2.f32 %v1230_v41 }
 0x3ad   :  { %v1490_v40 = vpop.eup %1489 }
 0x3ae   :  { %331 = vrot.lane.b32.xlu1 %v1490_v40, %s1548_s27 }
 0x3af   :  { %v1492_v42 = vpop.eup %1491 }
 0x3b0   :  { %v322_v43 = vadd.f32 1.0, %v1492_v42 }
 0x3b2   :  { %1493 = vrcp.f32 %v322_v43 }
 0x3bc   :  { %v1494_v44 = vpop.eup %1493 }
 0x3bd   :  { %v329_v48 = vmul.f32 %v1494_v44, %v327_v47 }
 0x420   :  { %v332_v45 = vpop.permute.xlu1 %331 }
 0x421   :  { %v334_v46 = vmul.f32 %v1494_v44, %v332_v45 }
 0x423   :  { %336 = vrot.lane.b32.xlu0 %v334_v46, %s1549_s5 }
 0x495   :  { %v337_v49 = vpop.permute.xlu0 %336 }
 0x496   :  { %v339_v50 = vadd.f32 %v337_v49, %v329_v48 }
 0x498   :  { %1495 = vtanh.f32 %v339_v50  ;;  %v434_v4 = vrot.slane %v339_v50, 6 }
 0x4a2   :  { %v1496_v51 = vpop.eup %1495 }
 0x4a3   :  { %342 = vrot.lane.b32.xlu1 %v1496_v51, %s1548_s27 }
 0x515   :  { %v343_v52 = vpop.permute.xlu1 %342 }
 0x516   :  { %v345_v53 = vmul.f32 %v1494_v44, %v343_v52 }
 0x518   :  { %v347_v54 = vrot.slane %v345_v53, 2  ;;  %v985_v15 = vsel %vm984_vm4, %v1673_v34, %v345_v53 }
 0x51a   :  { %348 = vrot.lane.b32.xlu0 %v347_v54, %s1549_s5 }
 0x58c   :  { %v349_v55 = vpop.permute.xlu0 %348 }
 0x58d   :  { %1327 = vmatmul.mubr.msk.f32.vlgmr.msra.gmra.mrb[6].mxu1 %vm137_vm3, %v349_v55 }
 0x58e   :  { %1404 = vmatpush3.bf16.msra.mxu1 %v1627_v7  ;;  %1337 = vmatprep.mubr.msk.f32.mxu1 %vm1546_vm2, %v1547_v9 }
 0x58f   :  { %1405 = vmatprep.subr.bf16.mxu1 %v1545_v3 }
 0x592   :  { %1407 = vmatpush3.bf16.msra.mxu1 %v1637_v10 }
 0x593   :  { %1408 = vmatprep.subr.bf16.mxu1 %v1545_v3 }
 0x660   :  { %v418_v56 = vpop.f32.mrb[6].mxu1 }
 0x661   :  { %v423_v57 = vrot.slane %v418_v56, 4  ;;  %v1328_v58 = vpop.f32.mrb[7].mxu1 }
 0x663   :  { %v425_v59 = vadd.f32 %v423_v57, %v1663_v16 }
 0x665   :  { %1497 = vtanh.f32 %v425_v59  ;;  %v1232_v61 = vmul.f32 -1.442695, %v425_v59 }
 0x667   :  { %1499 = vpow2.f32 %v1232_v61 }
 0x66f   :  { %v1498_v60 = vpop.eup %1497 }
 0x670   :  { %438 = vrot.lane.b32.xlu1 %v1498_v60, %s1548_s27 }
 0x671   :  { %v1500_v62 = vpop.eup %1499 }
 0x672   :  { %v429_v63 = vadd.f32 1.0, %v1500_v62 }
 0x674   :  { %1501 = vrcp.f32 %v429_v63 }
 0x67e   :  { %v1502_v0 = vpop.eup %1501 }
 0x67f   :  { %v436_v5 = vmul.f32 %v1502_v0, %v434_v4 }
 0x6e2   :  { %v439_v1 = vpop.permute.xlu1 %438 }
 0x6e3   :  { %v441_v2 = vmul.f32 %v1502_v0, %v439_v1 }
 0x6e5   :  { %443 = vrot.lane.b32.xlu0 %v441_v2, %s1549_s5 }
 0x757   :  { %v444_v6 = vpop.permute.xlu0 %443 }
 0x758   :  { %v446_v8 = vadd.f32 %v444_v6, %v436_v5 }
 0x75a   :  { %1503 = vtanh.f32 %v446_v8  ;;  %v541_v31 = vrot.slane %v446_v8, 6 }
 0x764   :  { %v1504_v11 = vpop.eup %1503 }
 0x765   :  { %449 = vrot.lane.b32.xlu1 %v1504_v11, %s1548_s27 }
 0x7d7   :  { %v450_v12 = vpop.permute.xlu1 %449 }
 0x7d8   :  { %v452_v13 = vmul.f32 %v1502_v0, %v450_v12 }
 0x7da   :  { %v454_v17 = vrot.slane %v452_v13, 4  ;;  %v986_v18 = vsel %vm56_vm0, %v985_v15, %v452_v13 }
 0x7dc   :  { %455 = vrot.lane.b32.xlu0 %v454_v17, %s1549_s5 }
 0x84e   :  { %v456_v19 = vpop.permute.xlu0 %455 }
 0x84f   :  { %1338 = vmatmul.mubr.msk.f32.vlgmr.msra.gmra.mrb[8].mxu1 %vm137_vm3, %v456_v19 }
 0x850   :  { %1410 = vmatpush3.bf16.msra.mxu1 %v1627_v7  ;;  %1348 = vmatprep.mubr.msk.f32.mxu1 %vm1546_vm2, %v1547_v9 }
 0x851   :  { %1411 = vmatprep.subr.bf16.mxu1 %v1545_v3 }
 0x854   :  { %1413 = vmatpush3.bf16.msra.mxu1 %v1637_v10 }
 0x855   :  { %1420 = vmatprep.subr.bf16.mxu1 %v1545_v3 }
 0x922   :  { %v525_v20 = vpop.f32.mrb[8].mxu1 }
 0x923   :  { %v530_v21 = vrot.slane %v525_v20, 2  ;;  %v1339_v22 = vpop.f32.mrb[9].mxu1 }
 0x925   :  { %v532_v23 = vadd.f32 %v530_v21, %v1663_v16 }
 0x927   :  { %1505 = vtanh.f32 %v532_v23  ;;  %v1234_v25 = vmul.f32 -1.442695, %v532_v23 }
 0x929   :  { %1507 = vpow2.f32 %v1234_v25 }
 0x931   :  { %v1506_v24 = vpop.eup %1505 }
 0x932   :  { %545 = vrot.lane.b32.xlu1 %v1506_v24, %s1548_s27 }
 0x933   :  { %v1508_v26 = vpop.eup %1507 }
 0x934   :  { %v536_v27 = vadd.f32 1.0, %v1508_v26 }
 0x936   :  { %1509 = vrcp.f32 %v536_v27 }
 0x940   :  { %v1510_v28 = vpop.eup %1509 }
 0x941   :  { %v543_v32 = vmul.f32 %v1510_v28, %v541_v31 }
 0x9a4   :  { %v546_v29 = vpop.permute.xlu1 %545 }
 0x9a5   :  { %v548_v30 = vmul.f32 %v1510_v28, %v546_v29 }
 0x9a7   :  { %550 = vrot.lane.b32.xlu0 %v548_v30, %s1549_s5 }
 0xa19   :  { %v551_v33 = vpop.permute.xlu0 %550 }
 0xa1a   :  { %v553_v34 = vadd.f32 %v551_v33, %v543_v32 }
 0xa1c   :  { %1511 = vtanh.f32 %v553_v34  ;;  %v645_v50 = vrot.slane %v553_v34, 6 }
 0xa26   :  { %v1512_v16 = vpop.eup %1511 }
 0xa27   :  { %556 = vrot.lane.b32.xlu1 %v1512_v16, %s1548_s27 }
 0xa99   :  { %v557_v35 = vpop.permute.xlu1 %556 }
 0xa9a   :  { %v559_v36 = vmul.f32 %v1510_v28, %v557_v35 }
 0xa9c   :  { %v561_v37 = vrot.slane %v559_v36, 6  ;;  %v1716_v38 = vsel %vm987_vm5, %v986_v18, %v559_v36 }
 0xa9e   :  { %562 = vrot.lane.b32.xlu0 %v561_v37, %s1549_s5 }
 0xb10   :  { %v563_v39 = vpop.permute.xlu0 %562 }
 0xb11   :  { %1349 = vmatmul.mubr.msk.f32.vlgmr.msra.gmra.mrb[10].mxu1 %vm137_vm3, %v563_v39 }
 0xb12   :  { %1422 = vmatpush3.bf16.msra.mxu1 %v1627_v7  ;;  %1370 = vmatprep.mubr.msk.f32.mxu1 %vm1546_vm2, %v1547_v9 }
 0xb13   :  { %1423 = vmatprep.subr.bf16.mxu1 %v1545_v3 }
 0xb16   :  { %1425 = vmatpush3.bf16.msra.mxu1 %v1637_v10 }
 0xbe4   :  { %v632_v40 = vpop.f32.mrb[10].mxu1 }
 0xbe5   :  { %v636_v41 = vadd.f32 %v632_v40, %v1661_v14  ;;  %v1350_v42 = vpop.f32.mrb[11].mxu1 }
 0xbe7   :  { %1513 = vtanh.f32 %v636_v41  ;;  %v1236_v44 = vmul.f32 -1.442695, %v636_v41 }
 0xbe9   :  { %1515 = vpow2.f32 %v1236_v44  ;;  %v993_v44 = vld [vmem:[%s1902_s6 + $0x8] sm:$0xff] }
 0xbf1   :  { %v1514_v43 = vpop.eup %1513 }
 0xbf2   :  { %649 = vrot.lane.b32.xlu1 %v1514_v43, %s1548_s27 }
 0xbf3   :  { %v1516_v45 = vpop.eup %1515 }
 0xbf4   :  { %v640_v46 = vadd.f32 1.0, %v1516_v45  ;;  %v995_v45 = vld [vmem:[%s1902_s6 + $0x18] sm:$0xff] }
 0xbf6   :  { %1517 = vrcp.f32 %v640_v46  ;;  %v992_v46 = vld [vmem:[%s1902_s6] sm:$0xff] }
 0xc00   :  { %v1518_v47 = vpop.eup %1517 }
 0xc01   :  { %v647_v51 = vmul.f32 %v1518_v47, %v645_v50 }
 0xc64   :  { %v650_v48 = vpop.permute.xlu1 %649 }
 0xc65   :  { %v652_v49 = vmul.f32 %v1518_v47, %v650_v48  ;;  %v994_v48 = vld [vmem:[%s1902_s6 + $0x10] sm:$0xff] }
 0xc67   :  { %654 = vrot.lane.b32.xlu0 %v652_v49, %s1549_s5  ;;  %v1434_v49 = vpack.c.bf16 %v994_v48, %v992_v46  ;;  %v1002_v46 = vlaneseq  ;;  %v1000_v48 = vld [vmem:[%s1904_s7] sm:$0x3] }
 0xcd9   :  { %v655_v52 = vpop.permute.xlu0 %654 }
 0xcda   :  { %v657_v53 = vadd.f32 %v655_v52, %v647_v51 }
 0xcdc   :  { %1519 = vtanh.f32 %v657_v53 }
 0xce6   :  { %v1520_v54 = vpop.eup %1519 }
 0xce7   :  { %660 = vrot.lane.b32.xlu1 %v1520_v54, %s1548_s27  ;;  %v999_v54 = vld [vmem:[%s1902_s6 + $0x38] sm:$0xff] }
 0xd59   :  { %v661_v55 = vpop.permute.xlu1 %660 }
 0xd5a   :  { %v1729_v56 = vmul.f32 %v1518_v47, %v661_v55  ;;  %v1432_v47 = vpack.c.bf16 %v995_v45, %v993_v44 }
 0xd5c   :  { %665 = vrot.lane.b32.xlu0 %v1729_v56, %s1549_s5  ;;  %1433 = vmatprep.subr.bf16.mxu1 %v1432_v47 }
 0xdce   :  { %v666_v57 = vpop.permute.xlu0 %665 }
 0xdcf   :  { %1360 = vmatmul.mubr.msk.f32.vlgmr.msra.gmra.mrb[0].mxu0 %vm137_vm3, %v666_v57  ;;  %v998_v57 = vld [vmem:[%s1902_s6 + $0x30] sm:$0xff] }
 0xdd0   :  { %1428 = vmatpush3.bf16.msra.mxu0 %v1627_v7  ;;  %1381 = vmatprep.mubr.msk.f32.mxu0 %vm1546_vm2, %v1547_v9 }
 0xdd1   :  { %1429 = vmatprep.subr.bf16.mxu0 %v1545_v3 }
 0xdd4   :  { %1431 = vmatpush3.bf16.msra.mxu0 %v1637_v10  ;;  %v751_v10 = vrot.slane %v657_v53, 6  ;;  %v997_v53 = vld [vmem:[%s1902_s6 + $0x28] sm:$0xff] }
 0xdd5   :  { %1440 = vmatprep.subr.bf16.mxu0 %v1545_v3  ;;  %v1436_v55 = vpack.c.bf16 %v999_v54, %v997_v53 }
 0xea2   :  { %v735_v58 = vpop.f32.mrb[0].mxu0 }
 0xea3   :  { %v740_v59 = vrot.slane %v735_v58, 6  ;;  %v1361_v60 = vpop.f32.mrb[1].mxu0 }
 0xea5   :  { %v742_v61 = vadd.f32 %v740_v59, %v1661_v14 }
 0xea7   :  { %1521 = vtanh.f32 %v742_v61  ;;  %v1238_v63 = vmul.f32 -1.442695, %v742_v61 }
 0xea9   :  { %1523 = vpow2.f32 %v1238_v63 }
 0xeb1   :  { %v1522_v62 = vpop.eup %1521 }
 0xeb2   :  { %755 = vrot.lane.b32.xlu1 %v1522_v62, %s1548_s27 }
 0xeb3   :  { %v1524_v7 = vpop.eup %1523 }
 0xeb4   :  { %v746_v0 = vadd.f32 1.0, %v1524_v7 }
 0xeb6   :  { %1525 = vrcp.f32 %v746_v0 }
 0xec0   :  { %v1526_v1 = vpop.eup %1525 }
 0xec1   :  { %v753_v5 = vmul.f32 %v1526_v1, %v751_v10 }
 0xf24   :  { %v756_v2 = vpop.permute.xlu1 %755 }
 0xf25   :  { %v758_v4 = vmul.f32 %v1526_v1, %v756_v2  ;;  %v1103_v2 = vld [vmem:[%s1903_s8] sm:$0xff] }
 0xf27   :  { %760 = vrot.lane.b32.xlu0 %v758_v4, %s1549_s5  ;;  %v1104_v4 = vld [vmem:[%s1903_s8 + $0x8] sm:$0xff] }
 0xf28   :  { %v1441_v10 = vpack.c.bf16 %v1104_v4, %v1103_v2 }
 0xf99   :  { %v761_v6 = vpop.permute.xlu0 %760 }
 0xf9a   :  { %v763_v8 = vadd.f32 %v761_v6, %v753_v5  ;;  %v1106_v5 = vld [vmem:[%s1903_s8 + $0x18] sm:$0xff] }
 0xf9c   :  { %1527 = vtanh.f32 %v763_v8  ;;  %v858_v29 = vrot.slane %v763_v8, 6  ;;  %v1107_v8 = vld [vmem:[%s1903_s8 + $0x20] sm:$0xff] }
 0xfa6   :  { %v1528_v11 = vpop.eup %1527 }
 0xfa7   :  { %766 = vrot.lane.b32.xlu1 %v1528_v11, %s1548_s27  ;;  %v1108_v11 = vld [vmem:[%s1903_s8 + $0x28] sm:$0xff] }
0x1019   :  { %v767_v12 = vpop.permute.xlu1 %766 }
0x101a   :  { %v769_v13 = vmul.f32 %v1526_v1, %v767_v12  ;;  %v1447_v12 = vpack.c.bf16 %v1108_v11, %v1107_v8 }
0x101c   :  { %v771_v15 = vrot.slane %v769_v13, 2  ;;  %v989_v35 = vsel %vm984_vm4, %v1729_v56, %v769_v13  ;;  %v996_v56 = vld [vmem:[%s1902_s6 + $0x20] sm:$0xff] }
0x101d   :  { %v1438_v58 = vpack.c.bf16 %v998_v57, %v996_v56  ;;  %v1245_v57 = vld [vmem:[%s1905_s9] ss:$0 sm:$0xff] }
0x101e   :  { %772 = vrot.lane.b32.xlu0 %v771_v15, %s1549_s5  ;;  %v1110_v15 = vld [vmem:[%s1903_s8 + $0x38] sm:$0xff] }
0x1090   :  { %v773_v17 = vpop.permute.xlu0 %772 }
0x1091   :  { %1371 = vmatmul.mubr.msk.f32.vlgmr.msra.gmra.mrb[12].mxu1 %vm137_vm3, %v773_v17 }
0x1092   :  { %1086 = vmatprep.mubr.f32.mxu1 %v1547_v9  ;;  %1435 = vmatpush1.bf16.msra.mxu1 %v1434_v49 }
0x1093   :  { %1437 = vmatprep.subr.bf16.mxu1 %v1436_v55 }
0x1096   :  { %1439 = vmatpush1.bf16.msra.mxu1 %v1438_v58 }
0x1164   :  { %v842_v18 = vpop.f32.mrb[12].mxu1 }
0x1165   :  { %v847_v19 = vrot.slane %v842_v18, 4  ;;  %v1372_v20 = vpop.f32.mrb[13].mxu1  ;;  %v1111_v18 = vld [vmem:[%s1903_s8 + $0x40] sm:$0xff] }
0x1167   :  { %v849_v21 = vadd.f32 %v847_v19, %v1661_v14  ;;  %v1112_v19 = vld [vmem:[%s1903_s8 + $0x48] sm:$0xff] }
0x1168   :  { %v1453_v20 = vpack.c.bf16 %v1112_v19, %v1111_v18 }
0x1169   :  { %1529 = vtanh.f32 %v849_v21  ;;  %v1240_v23 = vmul.f32 -1.442695, %v849_v21  ;;  %v1113_v21 = vld [vmem:[%s1903_s8 + $0x50] sm:$0xff] }
0x116b   :  { %1531 = vpow2.f32 %v1240_v23 }
0x1173   :  { %v1530_v22 = vpop.eup %1529 }
0x1174   :  { %862 = vrot.lane.b32.xlu1 %v1530_v22, %s1548_s27  ;;  %v1114_v22 = vld [vmem:[%s1903_s8 + $0x58] sm:$0xff] }
0x1175   :  { %v1532_v24 = vpop.eup %1531  ;;  %v1456_v23 = vpack.c.bf16 %v1114_v22, %v1113_v21 }
0x1176   :  { %v853_v25 = vadd.f32 1.0, %v1532_v24  ;;  %v1115_v24 = vld [vmem:[%s1903_s8 + $0x60] sm:$0xff] }
0x1178   :  { %1533 = vrcp.f32 %v853_v25  ;;  %v1116_v25 = vld [vmem:[%s1903_s8 + $0x68] sm:$0xff] }
0x1182   :  { %v1534_v26 = vpop.eup %1533 }
0x1183   :  { %v860_v30 = vmul.f32 %v1534_v26, %v858_v29 }
0x11e6   :  { %v863_v27 = vpop.permute.xlu1 %862 }
0x11e7   :  { %v865_v28 = vmul.f32 %v1534_v26, %v863_v27  ;;  %v1117_v27 = vld [vmem:[%s1903_s8 + $0x70] sm:$0xff] }
0x11e9   :  { %867 = vrot.lane.b32.xlu0 %v865_v28, %s1549_s5  ;;  %v1118_v28 = vld [vmem:[%s1903_s8 + $0x78] sm:$0xff] }
0x11ea   :  { %v1462_v29 = vpack.c.bf16 %v1118_v28, %v1117_v27 }
0x125b   :  { %v868_v31 = vpop.permute.xlu0 %867 }
0x125c   :  { %v870_v32 = vadd.f32 %v868_v31, %v860_v30  ;;  %v1119_v30 = vld [vmem:[%s1903_s8 + $0x80] sm:$0xff]  ;;  %v1120_v31 = vld [vmem:[%s1903_s8 + $0x88] sm:$0xff] }
0x125e   :  { %1535 = vtanh.f32 %v870_v32  ;;  %v965_v62 = vrot.slane %v870_v32, 6  ;;  %v1465_v32 = vpack.c.bf16 %v1120_v31, %v1119_v30 }
0x1268   :  { %v1536_v33 = vpop.eup %1535 }
0x1269   :  { %873 = vrot.lane.b32.xlu1 %v1536_v33, %s1548_s27  ;;  %v1121_v33 = vld [vmem:[%s1903_s8 + $0x90] sm:$0xff] }
0x12db   :  { %v874_v34 = vpop.permute.xlu1 %873 }
0x12dc   :  { %v876_v16 = vmul.f32 %v1534_v26, %v874_v34  ;;  %v1459_v26 = vpack.c.bf16 %v1116_v25, %v1115_v24  ;;  %v1122_v34 = vld [vmem:[%s1903_s8 + $0x98] sm:$0xff] }
0x12de   :  { %v878_v36 = vrot.slane %v876_v16, 4  ;;  %v1754_v37 = vsel %vm56_vm0, %v989_v35, %v876_v16  ;;  %v1468_v16 = vpack.c.bf16 %v1122_v34, %v1121_v33  ;;  %v1123_v35 = vld [vmem:[%s1903_s8 + $0xa0] sm:$0xff] }
0x12e0   :  { %879 = vrot.lane.b32.xlu0 %v878_v36, %s1549_s5  ;;  %v1124_v36 = vld [vmem:[%s1903_s8 + $0xa8] sm:$0xff] }
0x1352   :  { %v880_v39 = vpop.permute.xlu0 %879 }
0x1353   :  { %1382 = vmatmul.mubr.msk.f32.vlgmr.msra.gmra.mrb[2].mxu0 %vm137_vm3, %v880_v39  ;;  %v1471_v39 = vpack.c.bf16 %v1124_v36, %v1123_v35 }
0x1354   :  { %1442 = vmatpush1.bf16.msra.mxu0 %v1441_v10 }
0x1355   :  { %1443 = vmatprep.subr.bf16.mxu0 %v1545_v3 }
0x1426   :  { %v949_v40 = vpop.f32.mrb[2].mxu0 }
0x1427   :  { %v954_v41 = vrot.slane %v949_v40, 2  ;;  %v1383_v42 = vpop.f32.mrb[3].mxu0  ;;  %v1125_v40 = vld [vmem:[%s1903_s8 + $0xb0] sm:$0xff] }
0x1429   :  { %v956_v43 = vadd.f32 %v954_v41, %v1661_v14  ;;  %v1126_v41 = vld [vmem:[%s1903_s8 + $0xb8] sm:$0xff] }
0x142a   :  { %v1474_v42 = vpack.c.bf16 %v1126_v41, %v1125_v40 }
0x142b   :  { %1537 = vtanh.f32 %v956_v43  ;;  %v1242_v50 = vmul.f32 -1.442695, %v956_v43 }
0x142d   :  { %1539 = vpow2.f32 %v1242_v50 }
0x1435   :  { %v1538_v14 = vpop.eup %1537 }
0x1436   :  { %969 = vrot.lane.b32.xlu1 %v1538_v14, %s1548_s27 }
0x1437   :  { %v1540_v51 = vpop.eup %1539 }
0x1438   :  { %v960_v52 = vadd.f32 1.0, %v1540_v51 }
0x143a   :  { %1541 = vrcp.f32 %v960_v52 }
0x1444   :  { %v1784_v59 = vpop.eup %1541 }
0x1445   :  { %v967_v63 = vmul.f32 %v1784_v59, %v965_v62 }
0x14a8   :  { %v970_v60 = vpop.permute.xlu1 %969 }
0x14a9   :  { %v972_v61 = vmul.f32 %v1784_v59, %v970_v60 }
0x14ab   :  { %974 = vrot.lane.b32.xlu0 %v972_v61, %s1549_s5 }
0x14af   :  { %1014 = vrot.lane.b32.xlu0 %v1716_v38, %s1549_s5  ;;  %v1105_v38 = vld [vmem:[%s1903_s8 + $0x10] sm:$0xff] }
0x14b0   :  { %v1444_v6 = vpack.c.bf16 %v1106_v5, %v1105_v38 }
0x14b2   :  { %1445 = vmatpush1.bf16.msra.mxu0 %v1444_v6 }
0x14b3   :  { %1446 = vmatprep.subr.bf16.mxu0 %v1545_v3 }
0x14b6   :  { %1448 = vmatpush1.bf16.msra.mxu0 %v1447_v12 }
0x14b7   :  { %1449 = vmatprep.subr.bf16.mxu0 %v1545_v3 }
0x151d   :  { %v975_v7 = vpop.permute.xlu0 %974 }
0x151e   :  { %v977_v0 = vadd.f32 %v975_v7, %v967_v63 }
0x1520   :  { %1543 = vtanh.f32 %v977_v0 }
0x1521   :  { %v1015_v1 = vpop.permute.xlu0 %1014 }
0x1522   :  { %1243 = vmatmul.mubr.msk.f32.vlgmr.msra.gmra.mrb[14].mxu1 %vm137_vm3, %v1015_v1 }
0x1523   :  { %1092 = vmatprep.mubr.f32.mxu1 %v1547_v9  ;;  %v1109_v9 = vld [vmem:[%s1903_s8 + $0x30] sm:$0xff] }
0x1524   :  { %v1450_v17 = vpack.c.bf16 %v1110_v15, %v1109_v9 }
0x1526   :  { %1451 = vmatpush1.bf16.msra.mxu0 %v1450_v17 }
0x1527   :  { %1452 = vmatprep.subr.bf16.mxu0 %v1545_v3 }
0x152a   :  { %v1544_v13 = vpop.eup %1543  ;;  %1454 = vmatpush1.bf16.msra.mxu0 %v1453_v20 }
0x152b   :  { %980 = vrot.lane.b32.xlu1 %v1544_v13, %s1548_s27  ;;  %1455 = vmatprep.subr.bf16.mxu0 %v1545_v3 }
0x152e   :  { %1457 = vmatpush1.bf16.msra.mxu0 %v1456_v23 }
0x152f   :  { %1458 = vmatprep.subr.bf16.mxu0 %v1545_v3 }
0x1532   :  { %1460 = vmatpush1.bf16.msra.mxu0 %v1459_v26 }
0x1533   :  { %1461 = vmatprep.subr.bf16.mxu0 %v1545_v3 }
0x1536   :  { %1463 = vmatpush1.bf16.msra.mxu0 %v1462_v29 }
0x1537   :  { %1464 = vmatprep.subr.bf16.mxu0 %v1545_v3 }
0x153a   :  { %1466 = vmatpush1.bf16.msra.mxu0 %v1465_v32 }
0x153b   :  { %1467 = vmatprep.subr.bf16.mxu0 %v1545_v3 }
0x153e   :  { %1469 = vmatpush1.bf16.msra.mxu0 %v1468_v16 }
0x153f   :  { %1470 = vmatprep.subr.bf16.mxu0 %v1545_v3 }
0x1542   :  { %1472 = vmatpush1.bf16.msra.mxu0 %v1471_v39 }
0x1543   :  { %1473 = vmatprep.subr.bf16.mxu0 %v1545_v3  ;;  %v1003_v3 = vshrl.u32 %v1002_v46, 7 }
0x1545   :  { %v1004_v47 = vsub.s32 0, %v1003_v3  ;;  %v1008_v49 = vsub.s32 1, %v1003_v3 }
0x1546   :  { %1475 = vmatpush1.bf16.msra.mxu0 %v1474_v42 }
0x1547   :  { %v1005_v14 = vrot.slane %v1000_v48, %v1004_v47  ;;  %v1009_v50 = vrot.slane %v1000_v48, %v1008_v49 }
0x159d   :  { %v981_v43 = vpop.permute.xlu1 %980 }
0x159e   :  { %v983_v44 = vmul.f32 %v1784_v59, %v981_v43 }
0x15a0   :  { %v991_v45 = vsel %vm987_vm5, %v1754_v37, %v983_v44 }
0x15a1   :  { %1016 = vrot.lane.b32.xlu1 %v991_v45, %s1549_s5 }
0x15f5   :  { %v1088_v51 = vpop.f32.mrb[14].mxu1 }
0x15f6   :  { %v1089_v52 = vadd.f32 %v1088_v51, %v1005_v14  ;;  %v1090_v53 = vpop.f32.mrb[15].mxu1 }
0x15f7   :  { %v1091_v54 = vadd.f32 %v1090_v53, %v1009_v50 }
0x15f8   :  { %v1099_v56 = vmax.f32 %v1089_v52, 0.0 }
0x15f9   :  { %v1100_v55 = vmax.f32 %v1091_v54, 0.0 }
0x15fb   :  { %1246 = vmatprep.mubr.msk.f32.mxu0 %vm1134_vm6, %v1100_v55 }
0x15fc   :  { %1206 = vmatmul.mubr.f32.vlgmr.msra.gmra.mrb[4].mxu0 %v1099_v56 }
0x1613   :  { %v1017_v37 = vpop.permute.xlu1 %1016 }
0x1614   :  { %1244 = vmatmul.mubr.msk.f32.gmra.mrb[16].mxu1 %vm137_vm3, %v1017_v37 }
0x16cf   :  { %v1207_v58 = vpop.f32.mrb[4].mxu0 }
0x16d0   :  { %v1208_v59 = vadd.f32 %v1245_v57, %v1207_v58  ;;  %v1209_v60 = vpop.f32.mrb[5].mxu0 }
0x16d2   :  { %1217 = vst.msk [vmem:[%s1906_s10] sm:$0xff] %vm1216_vm7, %v1208_v59 }
0x16e7   :  { %v1094_v61 = vpop.f32.mrb[16].mxu1 }
0x16e8   :  { %v1095_v62 = vadd.f32 %v1094_v61, %v1005_v14  ;;  %v1096_v63 = vpop.f32.mrb[17].mxu1 }
0x16e9   :  { %v1097_v7 = vadd.f32 %v1096_v63, %v1009_v50 }
0x16ea   :  { %v1101_v1 = vmax.f32 %v1095_v62, 0.0 }
0x16eb   :  { %v1102_v0 = vmax.f32 %v1097_v7, 0.0 }
0x16ed   :  { %1247 = vmatprep.mubr.msk.f32.mxu0 %vm1134_vm6, %v1102_v0 }
0x16ee   :  { %1211 = vmatmul.mubr.f32.gmra.mrb[6].mxu0 %v1101_v1 }
0x17c1   :  { %v1212_v2 = vpop.f32.mrb[6].mxu0 }
0x17c2   :  { %v1213_v4 = vadd.f32 %v1245_v57, %v1212_v2  ;;  %v1214_v38 = vpop.f32.mrb[7].mxu0 }
0x17c4   :  { %1218 = vst.msk [vmem:[%s1906_s10 + $0x8] sm:$0xff] %vm1216_vm7, %v1213_v4 }

</bundles_post_ra>
